<compile_context>
chip_gen: v7x
topology: tpu7x:2x2x1
jax: 0.10.0
libtpu: 0.0.40
codegen_flags: <defaults>
</compile_context>

<pallas_src>
import functools

import jax
import jax.numpy as jnp
from jax.experimental import pallas as pl
from jax.experimental.pallas import tpu as pltpu


def _mshf_kernel(W, b_ref, x_ref, o_ref):
    # x_ref: (TB, L) block of flattened image slabs, L = H*W (lane-dense).
    x = x_ref[...].astype(jnp.float32)
    TB, L = x.shape

    zc1 = jnp.zeros((TB, 1), jnp.float32)
    zcW = jnp.zeros((TB, W), jnp.float32)

    # lane index -> w coordinate; zeroes the conv zero-padding at w edges.
    w_idx = jax.lax.broadcasted_iota(jnp.int32, (1, L), 1) % W

    # x[h, w-1] / x[h, w+1]: shift by +-1 along flattened L, mask w edges.
    xl = jnp.concatenate([zc1, x[:, : L - 1]], axis=1)
    xl = jnp.where(w_idx == 0, 0.0, xl)
    xr = jnp.concatenate([x[:, 1:], zc1], axis=1)
    xr = jnp.where(w_idx == W - 1, 0.0, xr)

    # x[h-1, w] / x[h+1, w]: shift by +-W; the zero fill is exactly the h pad.
    xu = jnp.concatenate([zcW, x[:, : L - W]], axis=1)
    xd = jnp.concatenate([x[:, W:], zcW], axis=1)

    two_x = 2.0 * x
    sxx = xl + xr - two_x                      # fxx minus bias
    syy = xu + xd - two_x                      # fyy minus bias

    # fxy = x[h-1,w-1] - x[h-1,w+1] - x[h+1,w-1] + x[h+1,w+1]
    g = xl - xr                                # x[h, w-1] - x[h, w+1]
    gu = jnp.concatenate([zcW, g[:, : L - W]], axis=1)
    gd = jnp.concatenate([g[:, W:], zcW], axis=1)

    b = b_ref[...].astype(jnp.float32)         # (TB, 3): [b_sum, b_diff, b_xy]
    b_sum, b_diff, b_xy = b[:, 0:1], b[:, 1:2], b[:, 2:3]

    fxy = gu - gd + b_xy
    s = sxx + syy + b_sum                      # fxx + fyy
    d = sxx - syy + b_diff                     # fxx - fyy
    hess = 0.5 * (s + jnp.sqrt(d * d + 4.0 * (fxy * fxy)))
    o_ref[...] = hess.astype(o_ref.dtype)


def _choose_tb(nc, l, itemsize=4, target_bytes=2 << 20, min_steps=2):
    """Rows (flattened N*C slabs) per grid step: ~target_bytes input tile,
    8-aligned second-to-last block dim, soft preference for >= min_steps."""
    cap = max(1, target_bytes // (l * itemsize))
    if nc >= min_steps * 8:
        cap = min(cap, max(8, nc // min_steps))   # keep >=2 steps for megacore
    if nc <= cap:
        return nc                                 # one fat block == full dim
    tb = max(8, (min(cap, nc) // 8) * 8)          # multiple of 8 (sublane tile)
    for cand in range(tb, max(7, (tb * 3) // 4), -8):
        if nc % cand == 0:                        # prefer an exact divisor
            return cand
    return tb                                     # ragged tail: Pallas masks it


def mshf_forward(x, bias_xx, bias_yy, bias_xy):
    """x: (N, C, H, W) float32. biases: (C,) float32. Returns (N, C, H, W)."""
    N, C, H, W = x.shape
    NC, L = N * C, H * W

    xf = x.reshape(NC, L)                          # free (contiguous) reshape

    # Fold biases once on the host side: [bxx+byy, bxx-byy, bxy] per channel,
    # tiled to one row per (n, c) slab (row nc = n*C + c -> channel nc % C).
    b = jnp.stack([bias_xx + bias_yy, bias_xx - bias_yy, bias_xy], axis=-1)
    b = jnp.tile(b.astype(jnp.float32), (N, 1))    # (NC, 3)

    TB = _choose_tb(NC, L, itemsize=x.dtype.itemsize)
    grid = (pl.cdiv(NC, TB),)

    out = pl.pallas_call(
        functools.partial(_mshf_kernel, W),
        out_shape=jax.ShapeDtypeStruct((NC, L), x.dtype),
        grid=grid,
        in_specs=[
            pl.BlockSpec((TB, 3), lambda i: (i, 0)),   # folded biases
            pl.BlockSpec((TB, L), lambda i: (i, 0)),   # input slabs
        ],
        out_specs=pl.BlockSpec((TB, L), lambda i: (i, 0)),
        compiler_params=pltpu.CompilerParams(
            dimension_semantics=("parallel",),
            vmem_limit_bytes=48 * 1024 * 1024,
        ),
    )(b, xf)

    return out.reshape(N, C, H, W)


def mshf_reference(x, bias_xx, bias_yy, bias_xy):
    """Pure-JAX reference (padded shift-based stencil math)."""
    xp = jnp.pad(x, ((0, 0), (0, 0), (1, 1), (1, 1)))
    c = xp[:, :, 1:-1, 1:-1]
    bxx = bias_xx[None, :, None, None]
    byy = bias_yy[None, :, None, None]
    bxy = bias_xy[None, :, None, None]
    fxx = xp[:, :, 1:-1, :-2] - 2.0 * c + xp[:, :, 1:-1, 2:] + bxx
    fyy = xp[:, :, :-2, 1:-1] - 2.0 * c + xp[:, :, 2:, 1:-1] + byy
    fxy = (xp[:, :, :-2, :-2] - xp[:, :, :-2, 2:]
           - xp[:, :, 2:, :-2] + xp[:, :, 2:, 2:]) + bxy
    return (fxx + fyy + jnp.sqrt((fxx - fyy) ** 2 + 4.0 * fxy ** 2)) * 0.5


if __name__ == "__main__":
    key = jax.random.PRNGKey(0)
    N, C, H, W = 2, 4, 16, 16

    kx, kbxx, kbyy, kbxy = jax.random.split(key, 4)
    x = jax.random.normal(kx, (N, C, H, W), dtype=jnp.float32)

    # PyTorch Conv2d default bias init: uniform(-1/sqrt(fan_in), 1/sqrt(fan_in)),
    # fan_in = 1 * 3 * 3 = 9 for depthwise conv.  Deterministic synthetic init.
    bound = 1.0 / jnp.sqrt(9.0)
    bias_xx = jax.random.uniform(kbxx, (C,), jnp.float32, -bound, bound)
    bias_yy = jax.random.uniform(kbyy, (C,), jnp.float32, -bound, bound)
    bias_xy = jax.random.uniform(kbxy, (C,), jnp.float32, -bound, bound)

    out = jax.block_until_ready(mshf_forward(x, bias_xx, bias_yy, bias_xy))
    ref = mshf_reference(x, bias_xx, bias_yy, bias_xy)

    assert out.shape == (N, C, H, W)
    assert jnp.allclose(out, ref, atol=1e-5, rtol=1e-5), float(
        jnp.max(jnp.abs(out - ref)))
    print("KERNEL_OK")
</pallas_src>

<mosaic_0001>
module attributes {stable_mosaic.version = 11 : i64} {
  func.func @_mshf_kernel(%arg0: i32, %arg1: memref<8x3xf32, #tpu.memory_space<vmem>>, %arg2: memref<8x256xf32, #tpu.memory_space<vmem>>, %arg3: memref<8x256xf32, #tpu.memory_space<vmem>>) attributes {dimension_semantics = [#tpu.dimension_semantics<parallel>], iteration_bounds = array<i64: 1>, scalar_prefetch = 0 : i64, scratch_operands = 0 : i64, tpu.core_type = #tpu.core_type<tc>, window_params = [{transform_indices = @transform_0, window_bounds = array<i64: 8, 3>}, {transform_indices = @transform_1, window_bounds = array<i64: 8, 256>}, {transform_indices = @transform_2, window_bounds = array<i64: 8, 256>}]} {
    %c0 = arith.constant 0 : index
    %c0_0 = arith.constant 0 : index
    %0 = vector.load %arg2[%c0, %c0_0] : memref<8x256xf32, #tpu.memory_space<vmem>>, vector<8x256xf32>
    %cst = arith.constant 0.000000e+00 : f32
    %1 = vector.broadcast %cst : f32 to vector<8x1xf32>
    %cst_1 = arith.constant 0.000000e+00 : f32
    %2 = vector.broadcast %cst_1 : f32 to vector<8x16xf32>
    %3 = tpu.iota {dimensions = array<i32: 1>} : vector<1x256xi32>
    %c16_i32 = arith.constant 16 : i32
    %c0_i32 = arith.constant 0 : i32
    %4 = arith.cmpi eq, %c16_i32, %c0_i32 : i32
    %c1_i32 = arith.constant 1 : i32
    %5 = arith.select %4, %c1_i32, %c16_i32 : i32
    %6 = vector.broadcast %5 : i32 to vector<1x256xi32>
    %7 = arith.remsi %3, %6 : vector<1x256xi32>
    %c0_i32_2 = arith.constant 0 : i32
    %8 = vector.broadcast %c0_i32_2 : i32 to vector<1x256xi32>
    %9 = arith.cmpi ne, %7, %8 : vector<1x256xi32>
    %c0_i32_3 = arith.constant 0 : i32
    %10 = vector.broadcast %c0_i32_3 : i32 to vector<1x256xi32>
    %11 = arith.cmpi slt, %7, %10 : vector<1x256xi32>
    %c0_i32_4 = arith.constant 0 : i32
    %12 = arith.cmpi slt, %5, %c0_i32_4 : i32
    %13 = vector.broadcast %12 : i1 to vector<1x256xi1>
    %14 = vector.broadcast %13 : vector<1x256xi1> to vector<1x256xi1>
    %15 = arith.xori %11, %14 : vector<1x256xi1>
    %16 = arith.andi %15, %9 : vector<1x256xi1>
    %17 = vector.broadcast %5 : i32 to vector<1x256xi32>
    %18 = arith.addi %7, %17 : vector<1x256xi32>
    %19 = arith.select %16, %18, %7 : vector<1x256xi1>, vector<1x256xi32>
    %20 = vector.extract_strided_slice %0 {offsets = [0, 0], sizes = [8, 255], strides = [1, 1]} : vector<8x256xf32> to vector<8x255xf32>
    %21 = tpu.concatenate %1, %20 in 1 : vector<8x1xf32>, vector<8x255xf32> -> vector<8x256xf32>
    %c0_i32_5 = arith.constant 0 : i32
    %22 = vector.broadcast %c0_i32_5 : i32 to vector<1x256xi32>
    %23 = arith.cmpi eq, %19, %22 : vector<1x256xi32>
    %cst_6 = arith.constant 0.000000e+00 : f32
    %24 = vector.shape_cast %23 : vector<1x256xi1> to vector<1x256xi1>
    %25 = vector.broadcast %24 : vector<1x256xi1> to vector<8x256xi1>
    %26 = vector.broadcast %cst_6 : f32 to vector<8x256xf32>
    %27 = arith.select %25, %26, %21 : vector<8x256xi1>, vector<8x256xf32>
    %28 = vector.extract_strided_slice %0 {offsets = [0, 1], sizes = [8, 255], strides = [1, 1]} : vector<8x256xf32> to vector<8x255xf32>
    %29 = tpu.concatenate %28, %1 in 1 : vector<8x255xf32>, vector<8x1xf32> -> vector<8x256xf32>
    %c15_i32 = arith.constant 15 : i32
    %30 = vector.broadcast %c15_i32 : i32 to vector<1x256xi32>
    %31 = arith.cmpi eq, %19, %30 : vector<1x256xi32>
    %cst_7 = arith.constant 0.000000e+00 : f32
    %32 = vector.shape_cast %31 : vector<1x256xi1> to vector<1x256xi1>
    %33 = vector.broadcast %32 : vector<1x256xi1> to vector<8x256xi1>
    %34 = vector.broadcast %cst_7 : f32 to vector<8x256xf32>
    %35 = arith.select %33, %34, %29 : vector<8x256xi1>, vector<8x256xf32>
    %36 = vector.extract_strided_slice %0 {offsets = [0, 0], sizes = [8, 240], strides = [1, 1]} : vector<8x256xf32> to vector<8x240xf32>
    %37 = tpu.concatenate %2, %36 in 1 : vector<8x16xf32>, vector<8x240xf32> -> vector<8x256xf32>
    %38 = vector.extract_strided_slice %0 {offsets = [0, 16], sizes = [8, 240], strides = [1, 1]} : vector<8x256xf32> to vector<8x240xf32>
    %39 = tpu.concatenate %38, %2 in 1 : vector<8x240xf32>, vector<8x16xf32> -> vector<8x256xf32>
    %cst_8 = arith.constant 2.000000e+00 : f32
    %40 = vector.broadcast %cst_8 : f32 to vector<8x256xf32>
    %41 = arith.mulf %40, %0 : vector<8x256xf32>
    %42 = arith.addf %27, %35 : vector<8x256xf32>
    %43 = arith.subf %42, %41 : vector<8x256xf32>
    %44 = arith.addf %37, %39 : vector<8x256xf32>
    %45 = arith.subf %44, %41 : vector<8x256xf32>
    %46 = arith.subf %27, %35 : vector<8x256xf32>
    %47 = vector.extract_strided_slice %46 {offsets = [0, 0], sizes = [8, 240], strides = [1, 1]} : vector<8x256xf32> to vector<8x240xf32>
    %48 = tpu.concatenate %2, %47 in 1 : vector<8x16xf32>, vector<8x240xf32> -> vector<8x256xf32>
    %49 = vector.extract_strided_slice %46 {offsets = [0, 16], sizes = [8, 240], strides = [1, 1]} : vector<8x256xf32> to vector<8x240xf32>
    %50 = tpu.concatenate %49, %2 in 1 : vector<8x240xf32>, vector<8x16xf32> -> vector<8x256xf32>
    %c0_9 = arith.constant 0 : index
    %c0_10 = arith.constant 0 : index
    %51 = vector.load %arg1[%c0_9, %c0_10] : memref<8x3xf32, #tpu.memory_space<vmem>>, vector<8x3xf32>
    %52 = vector.extract_strided_slice %51 {offsets = [0, 0], sizes = [8, 1], strides = [1, 1]} : vector<8x3xf32> to vector<8x1xf32>
    %53 = vector.extract_strided_slice %51 {offsets = [0, 1], sizes = [8, 1], strides = [1, 1]} : vector<8x3xf32> to vector<8x1xf32>
    %54 = vector.extract_strided_slice %51 {offsets = [0, 2], sizes = [8, 1], strides = [1, 1]} : vector<8x3xf32> to vector<8x1xf32>
    %55 = arith.subf %48, %50 : vector<8x256xf32>
    %56 = vector.broadcast %54 : vector<8x1xf32> to vector<8x256xf32>
    %57 = arith.addf %55, %56 : vector<8x256xf32>
    %58 = arith.addf %43, %45 : vector<8x256xf32>
    %59 = vector.broadcast %52 : vector<8x1xf32> to vector<8x256xf32>
    %60 = arith.addf %58, %59 : vector<8x256xf32>
    %61 = arith.subf %43, %45 : vector<8x256xf32>
    %62 = vector.broadcast %53 : vector<8x1xf32> to vector<8x256xf32>
    %63 = arith.addf %61, %62 : vector<8x256xf32>
    %64 = arith.mulf %63, %63 : vector<8x256xf32>
    %65 = arith.mulf %57, %57 : vector<8x256xf32>
    %cst_11 = arith.constant 4.000000e+00 : f32
    %66 = vector.broadcast %cst_11 : f32 to vector<8x256xf32>
    %67 = arith.mulf %66, %65 : vector<8x256xf32>
    %68 = arith.addf %64, %67 : vector<8x256xf32>
    %69 = math.sqrt %68 : vector<8x256xf32>
    %70 = arith.addf %60, %69 : vector<8x256xf32>
    %cst_12 = arith.constant 5.000000e-01 : f32
    %71 = vector.broadcast %cst_12 : f32 to vector<8x256xf32>
    %72 = arith.mulf %71, %70 : vector<8x256xf32>
    %c0_13 = arith.constant 0 : index
    %c0_14 = arith.constant 0 : index
    %73 = vector.load %arg3[%c0_13, %c0_14] : memref<8x256xf32, #tpu.memory_space<vmem>>, vector<8x256xf32>
    tpu.vector_store %arg3[%c0_13, %c0_14], %72 {strides = array<i32>} : memref<8x256xf32, #tpu.memory_space<vmem>>, vector<8x256xf32>,
    return
  }
  func.func @transform_0(%arg0: i32) -> (i32, i32) {
    %c0_i32 = arith.constant 0 : i32
    %c0_i32_0 = arith.constant 0 : i32
    return %arg0, %c0_i32 : i32, i32
  }
  func.func @transform_1(%arg0: i32) -> (i32, i32) {
    %c0_i32 = arith.constant 0 : i32
    %c0_i32_0 = arith.constant 0 : i32
    return %arg0, %c0_i32 : i32, i32
  }
  func.func @transform_2(%arg0: i32) -> (i32, i32) {
    %c0_i32 = arith.constant 0 : i32
    %c0_i32_0 = arith.constant 0 : i32
    return %arg0, %c0_i32 : i32, i32
  }
}

</mosaic_0001>

<bundles_post_ra>
// kernel: tpu_custom_call.1
= control target key start
LH: loop header
LB: loop body
LE: loop exit
PB: predicated region body
PF: predicated region fallthrough
CT: control target
= control target key end

     0   :  { %7 = vsyncpa [#allocation3], 0  ;;  %s340_s0 = inlined_call_operand.vmem [shape: f32[8,3], index: 0, kind: input, shape index: {}]   ;;  %s341_s1 = inlined_call_operand.hbm [shape: f32[8,256], index: 1, kind: input, shape index: {}]   ;;  %s342_s2 = inlined_call_operand.hbm [shape: f32[8,256], index: 2, kind: output, shape index: {}]  }
   0x1   :  { %8 = vsyncpa [#allocation4], 0  ;;  %s271_s9 = smov [#allocation2]   ;;  %s223_s13 = scalar_lea.hbm %s341_s1, 256 }
   0x2   :  { %s17_s10 = sshll.u32 %s271_s9, 4  ;;  %p224_p0 = scmp.ne.s32.totalorder %s341_s1, %s223_s13  ;;  %s18_s10 = int_to_ptr.vmem [resolvable:$true] %s17_s10 }
   0x3   :  { %p227_p1 = scmp.lt.u32.totalorder %s223_s13, %s341_s1 }
   0x5   :  { %p229_p2 = pnand %p227_p1, %p224_p0 }
   0x7   :  { %232 = shalt.err (!%p229_p2)
}
   0x8   :  { %s233_s18 = scalar_lea.vmem %s18_s10, 256  ;;  %p238_p4 = scmp.lt.s32.totalorder %s18_s10, %s18_s10 }
   0x9   :  { %p234_p3 = scmp.ne.s32.totalorder %s18_s10, %s233_s18  ;;  %p239_p5 = scmp.lt.s32.totalorder %s233_s18, %s233_s18 }
   0xb   :  { %p240_p6 = por %p239_p5, %p238_p4 }
   0xd   :  { %p241_p7 = pnand %p240_p6, %p234_p3 }
   0xf   :  { %244 = shalt.err (!%p241_p7)
}
  0x10   :  { %20 = dma.hbm_to_vmem [thread:$0]  %s341_s1, 256, %s18_s10, [#allocation3]  }
  0x11   :  { %267 = dma.done.wait [#allocation3], 256  }
  0x12   :  { %268 = vsyncadd [#allocation3], 4294967040  ;;  %v272_v0 = vmov 2   ;;  %v24_v1 = vld [vmem:[#allocation2] sm:$0xff]  ;;  %s273_s21 = smov 127   ;;  %s274_s22 = smov 1   ;;  %v26_v6 = vlaneseq }
  0x13   :  { %215 = vset.pattern.permute.xlu0 %v272_v0  ;;  %72 = vrot.lane.b32.xlu1 %v24_v1, %s273_s21  ;;  %v25_v2 = vld [vmem:[#allocation2 + $0x8] sm:$0xff]  ;;  %v137_v3 = vld [vmem:[%s340_s0] sm:$0xff]  ;;  %s275_s25 = smov 16   ;;  %s276_s1 = smov 112   ;;  %v277_v4 = vmov 1   ;;  %v278_v5 = vmov 0  }
  0x14   :  { %55 = vrot.lane.b32.xlu0 %v24_v1, %s274_s22  ;;  %v27_v7 = vand.u32 127, %v26_v6  ;;  %vm59_vm0 = vcmask 7168   ;;  %vm76_vm2 = vcmask 1039360   ;;  %v108_v17 = vmul.f32 2.0, %v25_v2  ;;  %s279_s0 = smov [#allocation5]  }
  0x15   :  { %v107_v21 = vmul.f32 2.0, %v24_v1  ;;  %vm93_vm6 = vcmask 130048   ;;  %vm102_vm7 = vcmask 916480   ;;  %s197_s26 = sshll.u32 %s279_s0, 4  ;;  %s198_s26 = int_to_ptr.vmem [resolvable:$true] %s197_s26 }
  0x16   :  { %v28_v8 = vadd.s32 128, %v27_v7  ;;  %v33_v9 = vand.u32 15, %v27_v7  ;;  %s245_s27 = scalar_lea.vmem %s198_s26, 256  ;;  %p250_p9 = scmp.lt.s32.totalorder %s198_s26, %s198_s26 }
  0x17   :  { %74 = vrot.lane.b32.xlu1 %v25_v2, %s273_s21  ;;  %p246_p8 = scmp.ne.s32.totalorder %s198_s26, %s245_s27  ;;  %p251_p10 = scmp.lt.s32.totalorder %s245_s27, %s245_s27 }
  0x18   :  { %57 = vrot.lane.b32.xlu0 %v25_v2, %s274_s22  ;;  %v40_v10 = vand.u32 15, %v28_v8  ;;  %vm64_vm1 = vcmp.eq.s32.totalorder %v33_v9, 0  ;;  %vm81_vm3 = vcmp.eq.s32.totalorder %v33_v9, 15 }
  0x19   :  { %p252_p11 = por %p251_p10, %p250_p9 }
  0x1a   :  { %vm82_vm4 = vcmp.eq.s32.totalorder %v40_v10, 15  ;;  %vm65_vm5 = vcmp.eq.s32.totalorder %v40_v10, 0 }
  0x1b   :  { %89 = vrot.lane.b32.xlu1 %v24_v1, %s275_s25  ;;  %p253_p12 = pnand %p252_p11, %p246_p8 }
  0x1c   :  { %142 = vperm.xlu0 %215, %v137_v3  }
  0x1f   :  { %91 = vrot.lane.b32.xlu1 %v25_v2, %s275_s25 }
  0x20   :  { %98 = vrot.lane.b32.xlu0 %v24_v1, %s276_s1 }
  0x21   :  { %216 = vset.pattern.permute.xlu0 %v277_v4 }
  0x23   :  { %100 = vrot.lane.b32.xlu1 %v25_v2, %s276_s1 }
  0x24   :  { %158 = vperm.xlu0 %216, %v137_v3  }
  0x28   :  { %217 = vset.pattern.permute.xlu0 %v278_v5 }
  0x85   :  { %v73_v11 = vpop.permute.xlu1 %72 }
  0x86   :  { %v56_v12 = vpop.permute.xlu0 %55 }
  0x87   :  { %v63_v13 = vsel %vm59_vm0, 0.0, %v56_v12 }
  0x88   :  { %v70_v14 = vsel %vm64_vm1, 0.0, %v63_v13 }
  0x89   :  { %v75_v15 = vpop.permute.xlu1 %74 }
  0x8a   :  { %v58_v16 = vpop.permute.xlu0 %57  ;;  %v77_v18 = vsel %vm76_vm2, %v73_v11, %v75_v15  ;;  %v80_v19 = vsel %vm76_vm2, %v75_v15, 0.0 }
  0x8b   :  { %v60_v20 = vsel %vm59_vm0, %v56_v12, %v58_v16  ;;  %v87_v22 = vsel %vm81_vm3, 0.0, %v77_v18  ;;  %v88_v23 = vsel %vm82_vm4, 0.0, %v80_v19 }
  0x8c   :  { %v71_v24 = vsel %vm65_vm5, 0.0, %v60_v20  ;;  %v109_v25 = vadd.f32 %v87_v22, %v70_v14  ;;  %v117_v26 = vsub.f32 %v70_v14, %v87_v22 }
  0x8d   :  { %v110_v27 = vadd.f32 %v88_v23, %v71_v24  ;;  %v90_v28 = vpop.permute.xlu1 %89  ;;  %v118_v31 = vsub.f32 %v71_v24, %v88_v23 }
  0x8e   :  { %129 = vrot.lane.b32.xlu0 %v117_v26, %s276_s1  ;;  %121 = vrot.lane.b32.xlu1 %v117_v26, %s275_s25  ;;  %v111_v30 = vsub.f32 %v109_v25, %v107_v21  ;;  %v97_v41 = vsel %vm93_vm6, 0.0, %v90_v28 }
  0x8f   :  { %v112_v29 = vsub.f32 %v110_v27, %v108_v17 }
  0x91   :  { %v92_v32 = vpop.permute.xlu1 %91 }
  0x92   :  { %150 = vperm.xlu0 %217, %v137_v3   ;;  %123 = vrot.lane.b32.xlu1 %v118_v31, %s275_s25  ;;  %v94_v33 = vsel %vm93_vm6, %v90_v28, %v92_v32 }
  0x95   :  { %v101_v34 = vpop.permute.xlu1 %100 }
  0x96   :  { %v106_v35 = vsel %vm102_vm7, %v101_v34, 0.0  ;;  %131 = vrot.lane.b32.xlu1 %v118_v31, %s276_s1  ;;  %218 = vset.pattern.permute.xlu0 %v277_v4 }
  0x97   :  { %v114_v36 = vadd.f32 %v106_v35, %v94_v33 }
  0x99   :  { %v116_v37 = vsub.f32 %v114_v36, %v108_v17 }
  0x9b   :  { %v143_v38 = vpop.permute.xlu0 %142  ;;  %v156_v39 = vsub.f32 %v112_v29, %v116_v37  ;;  %v148_v40 = vadd.f32 %v116_v37, %v112_v29 }
  0x9f   :  { %v99_v42 = vpop.permute.xlu0 %98 }
  0xa0   :  { %v103_v43 = vsel %vm102_vm7, %v99_v42, %v101_v34 }
  0xa1   :  { %v113_v44 = vadd.f32 %v103_v43, %v97_v41 }
  0xa3   :  { %v115_v45 = vsub.f32 %v113_v44, %v107_v21  ;;  %v159_v49 = vpop.permute.xlu0 %158 }
  0xa4   :  { %v162_v60 = vadd.f32 %v159_v49, %v156_v39 }
  0xa5   :  { %v155_v46 = vsub.f32 %v111_v30, %v115_v45  ;;  %v147_v47 = vadd.f32 %v115_v45, %v111_v30 }
  0xa6   :  { %v164_v2 = vmul.f32 %v162_v60, %v162_v60 }
  0xa7   :  { %v161_v59 = vadd.f32 %v159_v49, %v155_v46 }
  0xa9   :  { %v163_v1 = vmul.f32 %v161_v59, %v161_v59 }
 0x100   :  { %v122_v48 = vpop.permute.xlu1 %121  ;;  %v130_v51 = vpop.permute.xlu0 %129 }
 0x101   :  { %v128_v53 = vsel %vm93_vm6, 0.0, %v122_v48 }
 0x104   :  { %v124_v50 = vpop.permute.xlu1 %123 }
 0x105   :  { %v125_v54 = vsel %vm93_vm6, %v122_v48, %v124_v50 }
 0x108   :  { %v132_v52 = vpop.permute.xlu1 %131 }
 0x109   :  { %v133_v55 = vsel %vm102_vm7, %v130_v51, %v132_v52  ;;  %v136_v56 = vsel %vm102_vm7, %v132_v52, 0.0 }
 0x10a   :  { %v138_v57 = vsub.f32 %v128_v53, %v133_v55  ;;  %v139_v58 = vsub.f32 %v125_v54, %v136_v56 }
 0x10c   :  { %v145_v61 = vadd.f32 %v143_v38, %v138_v57  ;;  %v146_v62 = vadd.f32 %v143_v38, %v139_v58 }
 0x10e   :  { %v165_v63 = vmul.f32 %v145_v61, %v145_v61  ;;  %v166_v0 = vmul.f32 %v146_v62, %v146_v62 }
 0x110   :  { %v167_v3 = vmul.f32 4.0, %v165_v63  ;;  %v168_v4 = vmul.f32 4.0, %v166_v0 }
 0x111   :  { %v151_v7 = vpop.permute.xlu0 %150 }
 0x112   :  { %v169_v5 = vadd.f32 %v167_v3, %v163_v1  ;;  %v170_v6 = vadd.f32 %v168_v4, %v164_v2  ;;  %v154_v12 = vadd.f32 %v151_v7, %v148_v40  ;;  %v153_v17 = vadd.f32 %v151_v7, %v147_v47 }
 0x114   :  { %219 = vrsqrt.f32 %v170_v6  ;;  %vm180_vm8 = vcmp.eq.f32.partialorder %v170_v6, inf  ;;  %v183_v11 = vand.u32 2147483648, %v170_v6  ;;  %vm182_vm9 = vcmp.eq.f32.partialorder %v170_v6, 0.0 }
 0x115   :  { %221 = vrsqrt.f32 %v169_v5  ;;  %vm173_vm10 = vcmp.eq.f32.partialorder %v169_v5, inf  ;;  %v176_v15 = vand.u32 2147483648, %v169_v5  ;;  %vm175_vm11 = vcmp.eq.f32.partialorder %v169_v5, 0.0 }
 0x11e   :  { %v220_v8 = vpop.eup %219 }
 0x11f   :  { %v222_v9 = vpop.eup %221  ;;  %v179_v10 = vmul.f32 %v220_v8, %v170_v6 }
 0x120   :  { %v172_v13 = vmul.f32 %v222_v9, %v169_v5 }
 0x121   :  { %v181_v14 = vsel %vm180_vm8, %v170_v6, %v179_v10 }
 0x122   :  { %v184_v16 = vsel %vm182_vm9, %v183_v11, %v181_v14  ;;  %v174_v18 = vsel %vm173_vm10, %v169_v5, %v172_v13 }
 0x123   :  { %v177_v19 = vsel %vm175_vm11, %v176_v15, %v174_v18  ;;  %v186_v20 = vadd.f32 %v184_v16, %v154_v12 }
 0x124   :  { %v185_v21 = vadd.f32 %v177_v19, %v153_v17 }
 0x125   :  { %v188_v22 = vmul.f32 0.5, %v186_v20 }
 0x126   :  { %v187_v23 = vmul.f32 0.5, %v185_v21 }
 0x127   :  { %190 = vst [vmem:[#allocation5 + $0x8] sm:$0xff] %v188_v22 }
 0x128   :  { %189 = vst [vmem:[#allocation5] sm:$0xff] %v187_v23 }
 0x129   :  { %256 = shalt.err (!%p253_p12)
}
 0x12a   :  { %s257_s30 = scalar_lea.hbm %s342_s2, 256 }
 0x12b   :  { %p258_p13 = scmp.ne.s32.totalorder %s342_s2, %s257_s30  ;;  %p261_p0 = scmp.lt.u32.totalorder %s257_s30, %s342_s2 }
 0x12d   :  { %p263_p1 = pnand %p261_p0, %p258_p13 }
 0x12f   :  { %266 = shalt.err (!%p263_p1)
}
 0x130   :  { %200 = dma.vmem_to_hbm [thread:$0]  %s198_s26, 256, %s342_s2, [#allocation4]  }
 0x131   :  { %269 = dma.done.wait [#allocation4], 256  }
 0x132   :  { %270 = vsyncadd [#allocation4], 4294967040 }
 0x133   :  { %204 = vsyncpa [#allocation3], 1 }
 0x134   :  { %205 = vsyncpa [#allocation4], 1 }

</bundles_post_ra>
